<compile_context>
chip_gen: v7x
topology: tpu7x:2x2x1
jax: 0.10.0
libtpu: 0.0.40
codegen_flags: <defaults>
</compile_context>

<pallas_src>
import functools

import jax
import jax.numpy as jnp
from jax.experimental import pallas as pl
from jax.experimental.pallas import tpu as pltpu

HIDDEN_LAYER = 256
IN_FEATURES = 2
OUT_FEATURES = 3
LANE = 128


def _round_up(n, m):
    return ((n + m - 1) // m) * m


def _mlp_kernel(xT_ref, w1_ref, b1_ref, w2_ref, b2_ref, oT_ref):
    # xT: [2, TB] f32   w1: [256, 2] f32   b1: [256, 1] f32
    # w2: [3, 256] bf16 b2: [3, 1] f32     out: [3, TB] f32
    x0 = xT_ref[0:1, :]                       # [1, TB] -> sublane-broadcast
    x1 = xT_ref[1:2, :]                       # [1, TB]

    # Layer 1 (K=2) on the VPU: grid-invariant w1 columns take the
    # lane-broadcast; per-tile x rows take the cheap sublane-broadcast.
    hT = w1_ref[:, 0:1] * x0 + w1_ref[:, 1:2] * x1 + b1_ref[...]   # [256, TB]
    hT = jnp.maximum(hT, 0.0)                 # ReLU

    # Layer 2 (K=256) on the MXU, transposed orientation, bf16 operands,
    # f32 accumulation:  yT[3, TB] = w2[3, 256] @ hT[256, TB]
    yT = jnp.dot(w2_ref[...], hT.astype(jnp.bfloat16),
                 preferred_element_type=jnp.float32) + b2_ref[...]
    oT_ref[...] = yT.astype(oT_ref.dtype)


def _pick_tile(B, block_batch):
    """Batch tile on the lane axis: multiple of 128 (or the full batch for
    tiny B), capped at block_batch, and split so the grid has >=2 steps when
    B > 128 so both v7x TensorCores get work."""
    if B <= LANE:
        return B                              # single full-extent block
    tb = min(block_batch, _round_up(B, LANE))
    tb = min(tb, _round_up(-(-B // 2), LANE))  # >= 2 grid steps
    return max(tb, LANE)


@functools.partial(jax.jit, static_argnames=("block_batch",))
def network_forward(x, w1, b1, w2, b2, *, block_batch=2048):
    """x: [B, 2] f32; w1: [256, 2]; b1: [256]; w2: [3, 256]; b2: [3].
    Weights stay in PyTorch nn.Linear ([out, in]) convention. Returns [B, 3]."""
    B = x.shape[0]
    xT = jnp.transpose(x)                      # [2, B]   (tiny glue, jit-cached)
    b1_c = b1.reshape(HIDDEN_LAYER, 1)         # [256, 1]
    b2_c = b2.reshape(OUT_FEATURES, 1)         # [3, 1]
    w2_bf = w2.astype(jnp.bfloat16)            # cast once, VMEM-resident

    tb = _pick_tile(B, block_batch)
    grid = (pl.cdiv(B, tb),)

    cost = pl.CostEstimate(
        flops=2 * B * (IN_FEATURES * HIDDEN_LAYER + HIDDEN_LAYER * OUT_FEATURES),
        transcendentals=0,
        bytes_accessed=(
            B * (IN_FEATURES + OUT_FEATURES) * 4
            + (IN_FEATURES * HIDDEN_LAYER + HIDDEN_LAYER + OUT_FEATURES) * 4
            + HIDDEN_LAYER * OUT_FEATURES * 2
        ),
    )

    yT = pl.pallas_call(
        _mlp_kernel,
        out_shape=jax.ShapeDtypeStruct((OUT_FEATURES, B), x.dtype),
        grid=grid,
        in_specs=[
            # xT: tiled over the batch (lane) axis.
            pl.BlockSpec((IN_FEATURES, tb), lambda i: (0, i)),
            # weights / biases: constant index_map -> fetched once, resident.
            pl.BlockSpec((HIDDEN_LAYER, IN_FEATURES), lambda i: (0, 0)),
            pl.BlockSpec((HIDDEN_LAYER, 1), lambda i: (0, 0)),
            pl.BlockSpec((OUT_FEATURES, HIDDEN_LAYER), lambda i: (0, 0)),
            pl.BlockSpec((OUT_FEATURES, 1), lambda i: (0, 0)),
        ],
        out_specs=pl.BlockSpec((OUT_FEATURES, tb), lambda i: (0, i)),
        compiler_params=pltpu.CompilerParams(
            dimension_semantics=("parallel",),
        ),
        cost_estimate=cost,
    )(xT, w1, b1_c, w2_bf, b2_c)

    return jnp.transpose(yT)                   # [B, 3] to match module output


def init_params(key):
    """Deterministic init mimicking PyTorch nn.Linear defaults:
    U(-1/sqrt(fan_in), 1/sqrt(fan_in)) for both weight and bias."""
    k1, k2, k3, k4 = jax.random.split(key, 4)
    bound1 = 1.0 / jnp.sqrt(IN_FEATURES)
    bound2 = 1.0 / jnp.sqrt(HIDDEN_LAYER)
    w1 = jax.random.uniform(k1, (HIDDEN_LAYER, IN_FEATURES), jnp.float32,
                            -bound1, bound1)
    b1 = jax.random.uniform(k2, (HIDDEN_LAYER,), jnp.float32, -bound1, bound1)
    w2 = jax.random.uniform(k3, (OUT_FEATURES, HIDDEN_LAYER), jnp.float32,
                            -bound2, bound2)
    b2 = jax.random.uniform(k4, (OUT_FEATURES,), jnp.float32, -bound2, bound2)
    return w1, b1, w2, b2


def _reference(x, w1, b1, w2, b2):
    return jnp.maximum(x @ w1.T + b1, 0.0) @ w2.T + b2


if __name__ == "__main__":
    key = jax.random.PRNGKey(0)
    k_params, k_x1, k_x2 = jax.random.split(key, 3)

    w1, b1, w2, b2 = init_params(k_params)

    # bf16 MXU operands (f32 accumulation) -> compare vs the f32 reference
    # with a loosened tolerance.
    ATOL = 5e-2
    RTOL = 5e-2

    # Small batch of 2-D inputs, matching nn.Linear(2, ...) expectations.
    B = 8
    x = jax.random.normal(k_x1, (B, IN_FEATURES), dtype=jnp.float32)
    out = jax.block_until_ready(network_forward(x, w1, b1, w2, b2))
    ref = _reference(x, w1, b1, w2, b2)
    assert out.shape == (B, OUT_FEATURES), out.shape
    assert jnp.allclose(out, ref, atol=ATOL, rtol=RTOL), "mismatch vs reference (B=8)"

    # Batch that is not a multiple of 128 and spans 2 grid steps -> exercises
    # the partial last block and the >=2-step (megacore) tiling path.
    B2 = 300
    x2 = jax.random.normal(k_x2, (B2, IN_FEATURES), dtype=jnp.float32)
    out2 = jax.block_until_ready(network_forward(x2, w1, b1, w2, b2))
    ref2 = _reference(x2, w1, b1, w2, b2)
    assert out2.shape == (B2, OUT_FEATURES), out2.shape
    assert jnp.allclose(out2, ref2, atol=ATOL, rtol=RTOL), "mismatch vs reference (B=300)"

    print("KERNEL_OK")
</pallas_src>

<mosaic_0001>
module attributes {stable_mosaic.version = 11 : i64} {
  func.func @_mlp_kernel(%arg0: i32, %arg1: memref<2x8xf32, #tpu.memory_space<vmem>>, %arg2: memref<256x2xf32, #tpu.memory_space<vmem>>, %arg3: memref<256x1xf32, #tpu.memory_space<vmem>>, %arg4: memref<3x256xbf16, #tpu.memory_space<vmem>>, %arg5: memref<3x1xf32, #tpu.memory_space<vmem>>, %arg6: memref<3x8xf32, #tpu.memory_space<vmem>>) attributes {dimension_semantics = [#tpu.dimension_semantics<parallel>], iteration_bounds = array<i64: 1>, scalar_prefetch = 0 : i64, scratch_operands = 0 : i64, tpu.core_type = #tpu.core_type<tc>, window_params = [{transform_indices = @transform_0, window_bounds = array<i64: 2, 8>}, {pipeline_mode = #tpu.pipeline_mode<synchronous>, transform_indices = @transform_1, window_bounds = array<i64: 256, 2>}, {pipeline_mode = #tpu.pipeline_mode<synchronous>, transform_indices = @transform_2, window_bounds = array<i64: 256, 1>}, {pipeline_mode = #tpu.pipeline_mode<synchronous>, transform_indices = @transform_3, window_bounds = array<i64: 3, 256>}, {pipeline_mode = #tpu.pipeline_mode<synchronous>, transform_indices = @transform_4, window_bounds = array<i64: 3, 1>}, {transform_indices = @transform_5, window_bounds = array<i64: 3, 8>}]} {
    %c0 = arith.constant 0 : index
    %c0_0 = arith.constant 0 : index
    %0 = vector.load %arg1[%c0, %c0_0] : memref<2x8xf32, #tpu.memory_space<vmem>>, vector<1x8xf32>
    %c1 = arith.constant 1 : index
    %c0_1 = arith.constant 0 : index
    %1 = vector.load %arg1[%c1, %c0_1] : memref<2x8xf32, #tpu.memory_space<vmem>>, vector<1x8xf32>
    %c0_2 = arith.constant 0 : index
    %c0_3 = arith.constant 0 : index
    %2 = vector.load %arg2[%c0_2, %c0_3] : memref<256x2xf32, #tpu.memory_space<vmem>>, vector<256x1xf32>
    %3 = vector.broadcast %2 : vector<256x1xf32> to vector<256x8xf32>
    %4 = vector.broadcast %0 : vector<1x8xf32> to vector<256x8xf32>
    %5 = arith.mulf %3, %4 : vector<256x8xf32>
    %c0_4 = arith.constant 0 : index
    %c1_5 = arith.constant 1 : index
    %6 = vector.load %arg2[%c0_4, %c1_5] : memref<256x2xf32, #tpu.memory_space<vmem>>, vector<256x1xf32>
    %7 = vector.broadcast %6 : vector<256x1xf32> to vector<256x8xf32>
    %8 = vector.broadcast %1 : vector<1x8xf32> to vector<256x8xf32>
    %9 = arith.mulf %7, %8 : vector<256x8xf32>
    %10 = arith.addf %5, %9 : vector<256x8xf32>
    %c0_6 = arith.constant 0 : index
    %c0_7 = arith.constant 0 : index
    %11 = vector.load %arg3[%c0_6, %c0_7] : memref<256x1xf32, #tpu.memory_space<vmem>>, vector<256x1xf32>
    %12 = vector.broadcast %11 : vector<256x1xf32> to vector<256x8xf32>
    %13 = arith.addf %10, %12 : vector<256x8xf32>
    %cst = arith.constant 0.000000e+00 : f32
    %14 = vector.broadcast %cst : f32 to vector<256x8xf32>
    %15 = arith.maximumf %13, %14 : vector<256x8xf32>
    %c0_8 = arith.constant 0 : index
    %c0_9 = arith.constant 0 : index
    %16 = vector.load %arg4[%c0_8, %c0_9] : memref<3x256xbf16, #tpu.memory_space<vmem>>, vector<3x256xbf16>
    %17 = arith.truncf %15 : vector<256x8xf32> to vector<256x8xbf16>
    %cst_10 = arith.constant dense<0.000000e+00> : vector<3x8xf32>
    %18 = tpu.matmul %16, %17, %cst_10 {dimension_numbers = #tpu.dot_dimension_numbers<[1], [0], [0], [1], [0, 0, 1, 1], [], []>} : vector<3x256xbf16>, vector<256x8xbf16>, vector<3x8xf32> -> vector<3x8xf32>
    %c0_11 = arith.constant 0 : index
    %c0_12 = arith.constant 0 : index
    %19 = vector.load %arg5[%c0_11, %c0_12] : memref<3x1xf32, #tpu.memory_space<vmem>>, vector<3x1xf32>
    %20 = vector.broadcast %19 : vector<3x1xf32> to vector<3x8xf32>
    %21 = arith.addf %18, %20 : vector<3x8xf32>
    %c0_13 = arith.constant 0 : index
    %c0_14 = arith.constant 0 : index
    %22 = vector.load %arg6[%c0_13, %c0_14] : memref<3x8xf32, #tpu.memory_space<vmem>>, vector<3x8xf32>
    tpu.vector_store %arg6[%c0_13, %c0_14], %21 {strides = array<i32>} : memref<3x8xf32, #tpu.memory_space<vmem>>, vector<3x8xf32>,
    return
  }
  func.func @transform_0(%arg0: i32) -> (i32, i32) {
    %c0_i32 = arith.constant 0 : i32
    %c0_i32_0 = arith.constant 0 : i32
    return %c0_i32, %arg0 : i32, i32
  }
  func.func @transform_1(%arg0: i32) -> (i32, i32) {
    %c0_i32 = arith.constant 0 : i32
    %c0_i32_0 = arith.constant 0 : i32
    %c0_i32_1 = arith.constant 0 : i32
    return %c0_i32, %c0_i32_0 : i32, i32
  }
  func.func @transform_2(%arg0: i32) -> (i32, i32) {
    %c0_i32 = arith.constant 0 : i32
    %c0_i32_0 = arith.constant 0 : i32
    %c0_i32_1 = arith.constant 0 : i32
    return %c0_i32, %c0_i32_0 : i32, i32
  }
  func.func @transform_3(%arg0: i32) -> (i32, i32) {
    %c0_i32 = arith.constant 0 : i32
    %c0_i32_0 = arith.constant 0 : i32
    %c0_i32_1 = arith.constant 0 : i32
    return %c0_i32, %c0_i32_0 : i32, i32
  }
  func.func @transform_4(%arg0: i32) -> (i32, i32) {
    %c0_i32 = arith.constant 0 : i32
    %c0_i32_0 = arith.constant 0 : i32
    %c0_i32_1 = arith.constant 0 : i32
    return %c0_i32, %c0_i32_0 : i32, i32
  }
  func.func @transform_5(%arg0: i32) -> (i32, i32) {
    %c0_i32 = arith.constant 0 : i32
    %c0_i32_0 = arith.constant 0 : i32
    return %c0_i32, %arg0 : i32, i32
  }
}

</mosaic_0001>

<bundles_post_ra>
// kernel: network_forward.1
= control target key start
LH: loop header
LB: loop body
LE: loop exit
PB: predicated region body
PF: predicated region fallthrough
CT: control target
= control target key end

     0   :  { %v879_v2 = vmov 1   ;;  %v880_v3 = vmov 0   ;;  %s1380_s0 = inlined_call_operand.vmem [shape: f32[2,8], index: 0, kind: input, shape index: {}]   ;;  %s1381_s1 = inlined_call_operand.vmem [shape: f32[256,2], index: 1, kind: input, shape index: {}]   ;;  %s1382_s2 = inlined_call_operand.vmem [shape: f32[256,1], index: 2, kind: input, shape index: {}]   ;;  %s1383_s3 = inlined_call_operand.vmem [shape: bf16[3,256], index: 3, kind: input, shape index: {}]   ;;  %s1384_s4 = inlined_call_operand.vmem [shape: f32[3,1], index: 4, kind: input, shape index: {}]   ;;  %s1385_s5 = inlined_call_operand.hbm [shape: f32[3,8], index: 5, kind: output, shape index: {}]  }
   0x1   :  { %v915_v0 = vld [vmem:[%s1381_s1 + $0x80] sm:$0xff]  ;;  %v26_v1 = vld [vmem:[%s1381_s1 + $0x10] sm:$0xff]  ;;  %823 = vset.pattern.permute.xlu0 %v879_v2  ;;  %822 = vset.pattern.permute.xlu1 %v880_v3  ;;  %v27_v4 = vld [vmem:[%s1381_s1 + $0x18] sm:$0xff] }
   0x2   :  { %317 = vperm.xlu0 %823, %v915_v0   ;;  %68 = vperm.xlu1 %822, %v26_v1   ;;  %v25_v5 = vld [vmem:[%s1381_s1 + $0x8] sm:$0xff]  ;;  %v938_v7 = vld [vmem:[%s1381_s1 + $0x38] sm:$0xff]  ;;  %v44_v8 = vld [vmem:[%s1381_s1 + $0xa0] sm:$0xff] }
   0x3   :  { %v932_v6 = vld [vmem:[%s1381_s1 + $0x28] sm:$0xff]  ;;  %v952_v10 = vld [vmem:[%s1381_s1 + $0xb0] sm:$0xff] }
   0x4   :  { %v947_v9 = vld [vmem:[%s1381_s1 + $0x48] sm:$0xff] }
   0x6   :  { %73 = vperm.xlu1 %822, %v27_v4   ;;  %257 = vperm.xlu0 %823, %v25_v5  }
   0xa   :  { %83 = vperm.xlu1 %822, %v932_v6   ;;  %261 = vperm.xlu0 %823, %v26_v1  }
   0xe   :  { %93 = vperm.xlu1 %822, %v938_v7   ;;  %333 = vperm.xlu0 %823, %v44_v8  }
   0xf   :  { %10 = vsyncpa [#allocation3], 0  ;;  %v959_v11 = vld [vmem:[%s1381_s1 + $0x58] sm:$0xff]  ;;  %v964_v12 = vld [vmem:[%s1381_s1 + $0xc0] sm:$0xff]  ;;  %vm778_vm0 = vcmask 59392  }
  0x10   :  { %v971_v13 = vld [vmem:[%s1381_s1 + $0x68] sm:$0xff]  ;;  %v976_v14 = vld [vmem:[%s1381_s1 + $0xd0] sm:$0xff]  ;;  %v983_v15 = vld [vmem:[%s1381_s1 + $0x78] sm:$0xff] }
  0x11   :  { %v988_v16 = vld [vmem:[%s1381_s1 + $0xe0] sm:$0xff]  ;;  %v41_v17 = vld [vmem:[%s1381_s1 + $0x88] sm:$0xff]  ;;  %v998_v18 = vld [vmem:[%s1381_s1 + $0xf0] sm:$0xff] }
  0x12   :  { %103 = vperm.xlu1 %822, %v947_v9   ;;  %341 = vperm.xlu0 %823, %v952_v10   ;;  %v24_v19 = vld [vmem:[%s1381_s1] sm:$0xff]  ;;  %v42_v21 = vld [vmem:[%s1381_s1 + $0x90] sm:$0xff]  ;;  %v43_v24 = vld [vmem:[%s1381_s1 + $0x98] sm:$0xff] }
  0x13   :  { %v28_v20 = vld [vmem:[%s1381_s1 + $0x20] sm:$0xff]  ;;  %v1016_v22 = vld [vmem:[%s1381_s1 + $0x30] sm:$0xff]  ;;  %v465_v26 = vld [vmem:[%s1382_s2 + $0x88] sm:$0xff] }
  0x14   :  { %v1023_v23 = vld [vmem:[%s1381_s1 + $0x40] sm:$0xff]  ;;  %v1032_v25 = vld [vmem:[%s1381_s1 + $0x50] sm:$0xff]  ;;  %v45_v31 = vld [vmem:[%s1381_s1 + $0xa8] sm:$0xff] }
  0x15   :  { %v1041_v27 = vld [vmem:[%s1381_s1 + $0x60] sm:$0xff]  ;;  %v1048_v28 = vld [vmem:[%s1381_s1 + $0x70] sm:$0xff]  ;;  %v449_v32 = vld [vmem:[%s1382_s2 + $0x8] sm:$0xff] }
  0x16   :  { %113 = vperm.xlu1 %822, %v959_v11   ;;  %349 = vperm.xlu0 %823, %v964_v12   ;;  %v448_v29 = vld [vmem:[%s1382_s2] sm:$0xff]  ;;  %v467_v33 = vld [vmem:[%s1382_s2 + $0x98] sm:$0xff]  ;;  %v466_v34 = vld [vmem:[%s1382_s2 + $0x90] sm:$0xff] }
  0x17   :  { %v464_v30 = vld [vmem:[%s1382_s2 + $0x80] sm:$0xff]  ;;  %v450_v35 = vld [vmem:[%s1382_s2 + $0x10] sm:$0xff]  ;;  %v469_v36 = vld [vmem:[%s1382_s2 + $0xa8] sm:$0xff] }
  0x18   :  { %v452_v37 = vld [vmem:[%s1382_s2 + $0x20] sm:$0xff]  ;;  %v451_v38 = vld [vmem:[%s1382_s2 + $0x18] sm:$0xff]  ;;  %v454_v41 = vld [vmem:[%s1382_s2 + $0x30] sm:$0xff] }
  0x19   :  { %v47_v39 = vld [vmem:[%s1381_s1 + $0xb8] sm:$0xff]  ;;  %v468_v42 = vld [vmem:[%s1382_s2 + $0xa0] sm:$0xff]  ;;  %v473_v43 = vld [vmem:[%s1382_s2 + $0xc8] sm:$0xff] }
  0x1a   :  { %123 = vperm.xlu1 %822, %v971_v13   ;;  %357 = vperm.xlu0 %823, %v976_v14   ;;  %v471_v40 = vld [vmem:[%s1382_s2 + $0xb8] sm:$0xff]  ;;  %v456_v44 = vld [vmem:[%s1382_s2 + $0x40] sm:$0xff]  ;;  %v453_v47 = vld [vmem:[%s1382_s2 + $0x28] sm:$0xff] }
  0x1b   :  { %v475_v48 = vld [vmem:[%s1382_s2 + $0xd8] sm:$0xff]  ;;  %v49_v51 = vld [vmem:[%s1381_s1 + $0xc8] sm:$0xff]  ;;  %v458_v52 = vld [vmem:[%s1382_s2 + $0x50] sm:$0xff] }
  0x1c   :  { %v470_v57 = vld [vmem:[%s1382_s2 + $0xb0] sm:$0xff]  ;;  %v477_v58 = vld [vmem:[%s1382_s2 + $0xe8] sm:$0xff]  ;;  %v460_v61 = vld [vmem:[%s1382_s2 + $0x60] sm:$0xff] }
  0x1e   :  { %133 = vperm.xlu1 %822, %v983_v15   ;;  %365 = vperm.xlu0 %823, %v988_v16  }
  0x22   :  { %143 = vperm.xlu1 %822, %v41_v17   ;;  %373 = vperm.xlu0 %823, %v998_v18  }
  0x26   :  { %824 = vset.pattern.permute.xlu1 %v879_v2  ;;  %850 = vset.pattern.permute.xlu0 %v880_v3 }
  0x27   :  { %321 = vperm.xlu1 %824, %v41_v17   ;;  %58 = vperm.xlu0 %850, %v24_v19  }
  0x2b   :  { %63 = vperm.xlu0 %850, %v25_v5   ;;  %253 = vperm.xlu1 %824, %v24_v19   ;;  %v462_v5 = vld [vmem:[%s1382_s2 + $0x70] sm:$0xff] }
  0x2f   :  { %78 = vperm.xlu0 %850, %v28_v20   ;;  %825 = vset.pattern.permute.xlu1 %v880_v3 }
  0x30   :  { %148 = vperm.xlu1 %825, %v42_v21  }
  0x33   :  { %88 = vperm.xlu0 %850, %v1016_v22  }
  0x34   :  { %826 = vset.pattern.permute.xlu1 %v879_v2 }
  0x35   :  { %325 = vperm.xlu1 %826, %v42_v21  }
  0x37   :  { %98 = vperm.xlu0 %850, %v1023_v23  }
  0x39   :  { %329 = vperm.xlu1 %826, %v43_v24  }
  0x3b   :  { %108 = vperm.xlu0 %850, %v1032_v25  }
  0x3d   :  { %827 = vset.pattern.permute.xlu1 %v880_v3 }
  0x3e   :  { %567 = vperm.xlu1 %827, %v465_v26  }
  0x3f   :  { %118 = vperm.xlu0 %850, %v1041_v27  }
  0x42   :  { %828 = vset.pattern.permute.xlu1 %v879_v2 }
  0x43   :  { %128 = vperm.xlu0 %850, %v1048_v28   ;;  %265 = vperm.xlu1 %828, %v27_v4  }
  0x47   :  { %138 = vperm.xlu0 %850, %v915_v0   ;;  %829 = vset.pattern.permute.xlu1 %v880_v3  ;;  %v478_v0 = vld [vmem:[%s1382_s2 + $0xf0] sm:$0xff] }
  0x48   :  { %482 = vperm.xlu1 %829, %v448_v29  }
  0x4b   :  { %153 = vperm.xlu0 %850, %v43_v24  }
  0x4c   :  { %158 = vperm.xlu1 %829, %v44_v8   ;;  %v455_v8 = vld [vmem:[%s1382_s2 + $0x38] sm:$0xff] }
  0x4f   :  { %562 = vperm.xlu0 %850, %v464_v30   ;;  %v457_v30 = vld [vmem:[%s1382_s2 + $0x48] sm:$0xff] }
  0x50   :  { %163 = vperm.xlu1 %829, %v45_v31  }
  0x53   :  { %487 = vperm.xlu0 %850, %v449_v32  }
  0x54   :  { %830 = vset.pattern.permute.xlu1 %v879_v2 }
  0x55   :  { %337 = vperm.xlu1 %830, %v45_v31  }
  0x57   :  { %577 = vperm.xlu0 %850, %v467_v33  }
  0x59   :  { %831 = vset.pattern.permute.xlu1 %v880_v3 }
  0x5a   :  { %572 = vperm.xlu1 %831, %v466_v34  }
  0x5b   :  { %492 = vperm.xlu0 %850, %v450_v35   ;;  %v1227_v35 = vld [vmem:[%s1380_s0 + $0x1] ss:$0 sm:$0xff] }
  0x5e   :  { %832 = vset.pattern.permute.xlu1 %v879_v2 }
  0x5f   :  { %168 = vperm.xlu0 %850, %v952_v10   ;;  %269 = vperm.xlu1 %832, %v28_v20   ;;  %v472_v20 = vld [vmem:[%s1382_s2 + $0xc0] sm:$0xff] }
  0x63   :  { %587 = vperm.xlu0 %850, %v469_v36   ;;  %273 = vperm.xlu1 %832, %v932_v6   ;;  %v1232_v36 = vld [vmem:[%s1380_s0] ss:$0 sm:$0xff] }
  0x67   :  { %502 = vperm.xlu0 %850, %v452_v37   ;;  %833 = vset.pattern.permute.xlu1 %v880_v3 }
  0x68   :  { %497 = vperm.xlu1 %833, %v451_v38  }
  0x6b   :  { %178 = vperm.xlu0 %850, %v964_v12  }
  0x6c   :  { %173 = vperm.xlu1 %833, %v47_v39  }
  0x6f   :  { %597 = vperm.xlu0 %850, %v471_v40  }
  0x70   :  { %834 = vset.pattern.permute.xlu1 %v879_v2 }
  0x71   :  { %345 = vperm.xlu1 %834, %v47_v39  }
  0x73   :  { %512 = vperm.xlu0 %850, %v454_v41  }
  0x75   :  { %835 = vset.pattern.permute.xlu1 %v880_v3 }
  0x76   :  { %582 = vperm.xlu1 %835, %v468_v42   ;;  %v474_v42 = vld [vmem:[%s1382_s2 + $0xd0] sm:$0xff] }
  0x77   :  { %188 = vperm.xlu0 %850, %v976_v14   ;;  %v51_v14 = vld [vmem:[%s1381_s1 + $0xd8] sm:$0xff] }
  0x7a   :  { %836 = vset.pattern.permute.xlu1 %v879_v2 }
  0x7b   :  { %607 = vperm.xlu0 %850, %v473_v43   ;;  %277 = vperm.xlu1 %836, %v1016_v22  }
  0x7f   :  { %522 = vperm.xlu0 %850, %v456_v44   ;;  %281 = vperm.xlu1 %836, %v938_v7  }
  0x81   :  { %v1115_v45 = vpop.permute.xlu0 %317  ;;  %v1117_v46 = vpop.permute.xlu1 %68 }
  0x82   :  { %v400_v38 = vmul.f32 %v1227_v35, %v1115_v45 }
  0x83   :  { %198 = vperm.xlu0 %850, %v988_v16   ;;  %837 = vset.pattern.permute.xlu1 %v880_v3 }
  0x84   :  { %507 = vperm.xlu1 %837, %v453_v47  }
  0x85   :  { %v1127_v49 = vpop.permute.xlu1 %73  ;;  %v1129_v50 = vpop.permute.xlu0 %257 }
  0x86   :  { %v385_v44 = vmul.f32 %v1227_v35, %v1129_v50 }
  0x87   :  { %617 = vperm.xlu0 %850, %v475_v48  }
  0x88   :  { %183 = vperm.xlu1 %837, %v49_v51  }
  0x89   :  { %v1137_v53 = vpop.permute.xlu1 %83  ;;  %v1139_v54 = vpop.permute.xlu0 %261 }
  0x8b   :  { %532 = vperm.xlu0 %850, %v458_v52  }
  0x8c   :  { %838 = vset.pattern.permute.xlu1 %v879_v2 }
  0x8d   :  { %v1142_v55 = vpop.permute.xlu1 %93  ;;  %353 = vperm.xlu1 %838, %v49_v51   ;;  %v1144_v56 = vpop.permute.xlu0 %333 }
  0x8f   :  { %208 = vperm.xlu0 %850, %v998_v18  }
  0x91   :  { %v1153_v59 = vpop.permute.xlu1 %103  ;;  %839 = vset.pattern.permute.xlu1 %v880_v3  ;;  %v1156_v60 = vpop.permute.xlu0 %341 }
  0x92   :  { %592 = vperm.xlu1 %839, %v470_v57  }
  0x93   :  { %627 = vperm.xlu0 %850, %v477_v58  }
  0x95   :  { %v1161_v62 = vpop.permute.xlu1 %113  ;;  %v1163_v63 = vpop.permute.xlu0 %349 }
  0x96   :  { %840 = vset.pattern.permute.xlu1 %v879_v2 }
  0x97   :  { %542 = vperm.xlu0 %850, %v460_v61   ;;  %285 = vperm.xlu1 %840, %v1023_v23  }
  0x99   :  { %v1170_v1 = vpop.permute.xlu1 %123  ;;  %v1172_v4 = vpop.permute.xlu0 %357 }
  0x9b   :  { %632 = vperm.xlu0 %850, %v478_v0   ;;  %289 = vperm.xlu1 %840, %v947_v9   ;;  %v721_v9 = vld [vmem:[%s1384_s4] sm:$0x7] }
  0x9d   :  { %v1178_v6 = vpop.permute.xlu1 %133  ;;  %v1180_v7 = vpop.permute.xlu0 %365 }
  0x9f   :  { %552 = vperm.xlu0 %850, %v462_v5   ;;  %841 = vset.pattern.permute.xlu1 %v880_v3 }
  0xa0   :  { %517 = vperm.xlu1 %841, %v455_v8  }
  0xa1   :  { %v144_v10 = vpop.permute.xlu1 %143  ;;  %v1189_v12 = vpop.permute.xlu0 %373 }
  0xa2   :  { %v237_v43 = vmul.f32 %v1232_v36, %v144_v10 }
  0xa3   :  { %724 = vperm.xlu0 %850, %v721_v9  }
  0xa4   :  { %193 = vperm.xlu1 %841, %v51_v14  }
  0xa6   :  { %v322_v16 = vpop.permute.xlu1 %321  ;;  %v59_v17 = vpop.permute.xlu0 %58 }
  0xa7   :  { %v401_v39 = vmul.f32 %v1227_v35, %v322_v16  ;;  %v220_v47 = vmul.f32 %v1232_v36, %v59_v17 }
  0xa8   :  { %842 = vset.pattern.permute.xlu1 %v879_v2 }
  0xa9   :  { %361 = vperm.xlu1 %842, %v51_v14   ;;  %v433_v52 = vadd.f32 %v401_v39, %v237_v43 }
  0xaa   :  { %v64_v18 = vpop.permute.xlu0 %63  ;;  %v254_v19 = vpop.permute.xlu1 %253 }
  0xab   :  { %v221_v45 = vmul.f32 %v1232_v36, %v64_v18  ;;  %v384_v51 = vmul.f32 %v1227_v35, %v254_v19 }
  0xad   :  { %843 = vset.pattern.permute.xlu1 %v880_v3  ;;  %v416_v5 = vadd.f32 %v384_v51, %v220_v47  ;;  %v417_v9 = vadd.f32 %v385_v44, %v221_v45  ;;  %v386_v51 = vmul.f32 %v1227_v35, %v1139_v54 }
  0xae   :  { %v1199_v21 = vpop.permute.xlu0 %78  ;;  %602 = vperm.xlu1 %843, %v472_v20  }
  0xaf   :  { %v149_v22 = vpop.permute.xlu1 %148 }
  0xb0   :  { %v238_v39 = vmul.f32 %v1232_v36, %v149_v22 }
  0xb2   :  { %v1201_v23 = vpop.permute.xlu0 %88  ;;  %844 = vset.pattern.permute.xlu1 %v879_v2 }
  0xb3   :  { %293 = vperm.xlu1 %844, %v1032_v25   ;;  %v53_v25 = vld [vmem:[%s1381_s1 + $0xe8] sm:$0xff] }
  0xb4   :  { %v326_v24 = vpop.permute.xlu1 %325 }
  0xb6   :  { %v1205_v26 = vpop.permute.xlu0 %98 }
  0xb7   :  { %297 = vperm.xlu1 %844, %v959_v11  }
  0xb8   :  { %v330_v29 = vpop.permute.xlu1 %329 }
  0xba   :  { %v1211_v31 = vpop.permute.xlu0 %108 }
  0xbb   :  { %845 = vset.pattern.permute.xlu1 %v880_v3 }
  0xbc   :  { %527 = vperm.xlu1 %845, %v457_v30   ;;  %v402_v30 = vmul.f32 %v1227_v35, %v326_v24 }
  0xbd   :  { %v568_v32 = vpop.permute.xlu1 %567 }
  0xbe   :  { %v1217_v33 = vpop.permute.xlu0 %118  ;;  %v657_v61 = vadd.f32 %v568_v32, %v433_v52  ;;  %v403_v32 = vmul.f32 %v1227_v35, %v330_v29  ;;  %v434_v24 = vadd.f32 %v402_v30, %v238_v39  ;;  %v55_v29 = vld [vmem:[%s1381_s1 + $0xf8] sm:$0xff]  ;;  %v222_v52 = vmul.f32 %v1232_v36, %v1117_v46 }
  0xc0   :  { %203 = vperm.xlu1 %845, %v53_v25   ;;  %v689_v10 = vmax.f32 %v657_v61, 0.0  ;;  %v418_v54 = vadd.f32 %v386_v51, %v222_v52 }
  0xc2   :  { %v1219_v34 = vpop.permute.xlu0 %128  ;;  %v1221_v11 = vpop.permute.xlu1 %265 }
  0xc4   :  { %846 = vset.pattern.permute.xlu1 %v879_v2 }
  0xc5   :  { %369 = vperm.xlu1 %846, %v53_v25  }
  0xc6   :  { %v139_v37 = vpop.permute.xlu0 %138 }
  0xc7   :  { %v236_v40 = vmul.f32 %v1232_v36, %v139_v37  ;;  %v483_v41 = vpop.permute.xlu1 %482 }
  0xc8   :  { %v640_v14 = vadd.f32 %v483_v41, %v416_v5  ;;  %v476_v5 = vld [vmem:[%s1382_s2 + $0xe0] sm:$0xff] }
  0xc9   :  { %847 = vset.pattern.permute.xlu1 %v880_v3  ;;  %v432_v58 = vadd.f32 %v400_v38, %v236_v40  ;;  %v459_v38 = vld [vmem:[%s1382_s2 + $0x58] sm:$0xff] }
  0xca   :  { %v154_v48 = vpop.permute.xlu0 %153  ;;  %612 = vperm.xlu1 %847, %v474_v42   ;;  %v672_v37 = vmax.f32 %v640_v14, 0.0 }
  0xcb   :  { %v1248_v57 = vpop.permute.xlu1 %158  ;;  %v239_v17 = vmul.f32 %v1232_v36, %v154_v48 }
  0xcc   :  { %v240_v30 = vmul.f32 %v1232_v36, %v1248_v57 }
  0xcd   :  { %v435_v41 = vadd.f32 %v403_v32, %v239_v17 }
  0xce   :  { %v563_v0 = vpop.permute.xlu0 %562  ;;  %848 = vset.pattern.permute.xlu1 %v879_v2 }
  0xcf   :  { %v656_v8 = vadd.f32 %v563_v0, %v432_v58  ;;  %301 = vperm.xlu1 %848, %v1041_v27   ;;  %v1252_v50 = vpop.permute.xlu1 %163  ;;  %v387_v58 = vmul.f32 %v1227_v35, %v1221_v11 }
  0xd0   :  { %v241_v32 = vmul.f32 %v1232_v36, %v1252_v50 }
  0xd1   :  { %v688_v16 = vmax.f32 %v656_v8, 0.0  ;;  %v223_v8 = vmul.f32 %v1232_v36, %v1127_v49  ;;  %v404_v49 = vmul.f32 %v1227_v35, %v1144_v56  ;;  %v479_v56 = vld [vmem:[%s1382_s2 + $0xf8] sm:$0xff] }
  0xd2   :  { %v488_v18 = vpop.permute.xlu0 %487 }
  0xd3   :  { %v641_v19 = vadd.f32 %v488_v18, %v417_v9  ;;  %305 = vperm.xlu1 %848, %v971_v13   ;;  %v713_v20 = vpack.c.bf16 %v689_v10, %v688_v16  ;;  %v419_v10 = vadd.f32 %v387_v58, %v223_v8 }
  0xd4   :  { %v338_v25 = vpop.permute.xlu1 %337 }
  0xd5   :  { %v673_v27 = vmax.f32 %v641_v19, 0.0  ;;  %797 = vmatprep.subr.bf16.mxu0 %v713_v20  ;;  %v405_v20 = vmul.f32 %v1227_v35, %v338_v25 }
  0xd6   :  { %v578_v40 = vpop.permute.xlu0 %577 }
  0xd7   :  { %849 = vset.pattern.permute.xlu1 %v880_v3  ;;  %v705_v13 = vpack.c.bf16 %v673_v27, %v672_v37  ;;  %v659_v42 = vadd.f32 %v578_v40, %v435_v41  ;;  %v437_v27 = vadd.f32 %v405_v20, %v241_v32  ;;  %v463_v40 = vld [vmem:[%s1382_s2 + $0x78] sm:$0xff] }
  0xd8   :  { %537 = vperm.xlu1 %849, %v459_v38  }
  0xd9   :  { %v573_v43 = vpop.permute.xlu1 %572  ;;  %798 = vmatpush3.bf16.msra.mxu0 %v705_v13  ;;  %v691_v47 = vmax.f32 %v659_v42, 0.0 }
  0xda   :  { %v658_v44 = vadd.f32 %v573_v43, %v434_v24  ;;  %v493_v0 = vpop.permute.xlu0 %492 }
  0xdb   :  { %v642_v9 = vadd.f32 %v493_v0, %v418_v54 }
  0xdc   :  { %v690_v48 = vmax.f32 %v658_v44, 0.0  ;;  %213 = vperm.xlu1 %849, %v55_v29   ;;  %v225_v44 = vmul.f32 %v1232_v36, %v1137_v53 }
  0xdd   :  { %v674_v16 = vmax.f32 %v642_v9, 0.0  ;;  %v406_v9 = vmul.f32 %v1227_v35, %v1156_v60 }
  0xde   :  { %v714_v45 = vpack.c.bf16 %v691_v47, %v690_v48  ;;  %v270_v22 = vpop.permute.xlu1 %269  ;;  %v169_v11 = vpop.permute.xlu0 %168  ;;  %v1308_v48 = vld.sshfl [vmem:[%s1383_s3] sm:$0x33 pattern:$0x76325410] }
  0xdf   :  { %v388_v42 = vmul.f32 %v1227_v35, %v270_v22 }
  0xe0   :  { %851 = vset.pattern.permute.xlu1 %v879_v2  ;;  %799 = vmatprep.subr.bf16.mxu0 %v714_v45 }
  0xe1   :  { %377 = vperm.xlu1 %851, %v55_v29  }
  0xe2   :  { %v274_v61 = vpop.permute.xlu1 %273  ;;  %v588_v37 = vpop.permute.xlu0 %587 }
  0xe3   :  { %v661_v25 = vadd.f32 %v588_v37, %v437_v27  ;;  %v389_v24 = vmul.f32 %v1227_v35, %v274_v61 }
  0xe5   :  { %852 = vset.pattern.permute.xlu1 %v880_v3  ;;  %v693_v39 = vmax.f32 %v661_v25, 0.0  ;;  %v421_v51 = vadd.f32 %v389_v24, %v225_v44  ;;  %v227_v25 = vmul.f32 %v1232_v36, %v1142_v55  ;;  %v408_v55 = vmul.f32 %v1227_v35, %v1163_v63 }
  0xe6   :  { %622 = vperm.xlu1 %852, %v476_v5   ;;  %v503_v29 = vpop.permute.xlu0 %502  ;;  %v229_v63 = vmul.f32 %v1232_v36, %v1153_v59  ;;  %v410_v59 = vmul.f32 %v1227_v35, %v1172_v4  ;;  %v231_v4 = vmul.f32 %v1232_v36, %v1161_v62  ;;  %v412_v62 = vmul.f32 %v1227_v35, %v1180_v7 }
  0xe7   :  { %v498_v14 = vpop.permute.xlu1 %497 }
  0xe8   :  { %v643_v46 = vadd.f32 %v498_v14, %v419_v10  ;;  %v242_v10 = vmul.f32 %v1232_v36, %v169_v11 }
  0xea   :  { %v675_v17 = vmax.f32 %v643_v46, 0.0  ;;  %853 = vset.pattern.permute.xlu1 %v879_v2  ;;  %v179_v8 = vpop.permute.xlu0 %178 }
  0xeb   :  { %309 = vperm.xlu1 %853, %v1048_v28   ;;  %v174_v18 = vpop.permute.xlu1 %173  ;;  %v461_v28 = vld [vmem:[%s1382_s2 + $0x68] sm:$0xff]  ;;  %v244_v24 = vmul.f32 %v1232_v36, %v179_v8  ;;  %s881_s2 = smov [#allocation2]  }
  0xec   :  { %v706_v19 = vpack.c.bf16 %v675_v17, %v674_v16  ;;  %v243_v54 = vmul.f32 %v1232_v36, %v174_v18  ;;  %s786_s3 = sshll.u32 %s881_s2, 4  ;;  %s787_s3 = int_to_ptr.vmem [resolvable:$true] %s786_s3 }
  0xed   :  { %s855_s26 = scalar_lea.vmem %s787_s3, 64  ;;  %p860_p1 = scmp.lt.s32.totalorder %s787_s3, %s787_s3 }
  0xee   :  { %800 = vmatpush3.bf16.msra.mxu0 %v706_v19  ;;  %v598_v16 = vpop.permute.xlu0 %597  ;;  %v438_v19 = vadd.f32 %v406_v9, %v242_v10  ;;  %p856_p0 = scmp.ne.s32.totalorder %s787_s3, %s855_s26  ;;  %p861_p2 = scmp.lt.s32.totalorder %s855_s26, %s855_s26 }
  0xef   :  { %313 = vperm.xlu1 %853, %v983_v15   ;;  %v436_v15 = vadd.f32 %v404_v49, %v240_v30 }
  0xf0   :  { %v346_v2 = vpop.permute.xlu1 %345  ;;  %p862_p3 = por %p861_p2, %p860_p1 }
  0xf1   :  { %v407_v5 = vmul.f32 %v1227_v35, %v346_v2  ;;  %v226_v2 = vmul.f32 %v1232_v36, %v1201_v23 }
  0xf2   :  { %p863_p4 = pnand %p862_p3, %p856_p0 }
  0xf3   :  { %854 = vset.pattern.permute.xlu1 %v880_v3  ;;  %v224_v3 = vmul.f32 %v1232_v36, %v1199_v21  ;;  %v735_v21 = vcombine.high %v1308_v48, %v1308_v48  ;;  %v439_v14 = vadd.f32 %v407_v5, %v243_v54 }
  0xf4   :  { %547 = vperm.xlu1 %854, %v461_v28  }
  0xf5   :  { %v583_v38 = vpop.permute.xlu1 %582  ;;  %v420_v47 = vadd.f32 %v388_v42, %v224_v3  ;;  %770 = vmatprep.mubr.bf16.mxu0 %v735_v21  ;;  %v663_v17 = vadd.f32 %v598_v16, %v439_v14 }
  0xf6   :  { %v660_v57 = vadd.f32 %v583_v38, %v436_v15  ;;  %v513_v15 = vpop.permute.xlu0 %512 }
  0xf7   :  { %v644_v45 = vadd.f32 %v503_v29, %v420_v47  ;;  %v695_v32 = vmax.f32 %v663_v17, 0.0 }
  0xf8   :  { %v692_v50 = vmax.f32 %v660_v57, 0.0  ;;  %637 = vperm.xlu1 %854, %v479_v56  }
  0xf9   :  { %v676_v58 = vmax.f32 %v644_v45, 0.0  ;;  %v440_v45 = vadd.f32 %v408_v55, %v244_v24 }
  0xfa   :  { %v715_v41 = vpack.c.bf16 %v693_v39, %v692_v50  ;;  %v278_v13 = vpop.permute.xlu1 %277  ;;  %v189_v3 = vpop.permute.xlu0 %188 }
  0xfb   :  { %v390_v18 = vmul.f32 %v1227_v35, %v278_v13 }
  0xfc   :  { %557 = vperm.xlu1 %854, %v463_v40   ;;  %801 = vmatprep.subr.bf16.mxu0 %v715_v41 }
  0xfd   :  { %v422_v60 = vadd.f32 %v390_v18, %v226_v2  ;;  %v246_v2 = vmul.f32 %v1232_v36, %v189_v3 }
  0xfe   :  { %v282_v43 = vpop.permute.xlu1 %281  ;;  %v608_v44 = vpop.permute.xlu0 %607 }
  0xff   :  { %v391_v11 = vmul.f32 %v1227_v35, %v282_v43  ;;  %v646_v38 = vadd.f32 %v513_v15, %v422_v60 }
 0x101   :  { %v423_v56 = vadd.f32 %v391_v11, %v227_v25  ;;  %v678_v50 = vmax.f32 %v646_v38, 0.0  ;;  %v442_v11 = vadd.f32 %v410_v59, %v246_v2  ;;  %v234_v59 = vmul.f32 %v1232_v36, %v1219_v34 }
 0x102   :  { %v523_v9 = vpop.permute.xlu0 %522 }
 0x103   :  { %v508_v22 = vpop.permute.xlu1 %507 }
 0x104   :  { %v645_v52 = vadd.f32 %v508_v22, %v421_v51 }
 0x106   :  { %v677_v61 = vmax.f32 %v645_v52, 0.0 }
 0x107   :  { %v184_v0 = vpop.permute.xlu1 %183 }
 0x108   :  { %v707_v53 = vpack.c.bf16 %v677_v61, %v676_v58  ;;  %v245_v42 = vmul.f32 %v1232_v36, %v184_v0  ;;  %v228_v0 = vmul.f32 %v1232_v36, %v1205_v26  ;;  %v199_v26 = vpop.permute.xlu0 %198 }
 0x10a   :  { %802 = vmatpush3.bf16.msra.mxu0 %v707_v53 }
 0x10c   :  { %v354_v46 = vpop.permute.xlu1 %353 }
 0x10d   :  { %v409_v41 = vmul.f32 %v1227_v35, %v354_v46 }
 0x10f   :  { %v441_v43 = vadd.f32 %v409_v41, %v245_v42 }
 0x111   :  { %v593_v20 = vpop.permute.xlu1 %592  ;;  %v665_v47 = vadd.f32 %v608_v44, %v441_v43 }
 0x112   :  { %v662_v49 = vadd.f32 %v593_v20, %v438_v19 }
 0x113   :  { %v697_v52 = vmax.f32 %v665_v47, 0.0 }
 0x114   :  { %v694_v30 = vmax.f32 %v662_v49, 0.0 }
 0x116   :  { %v716_v37 = vpack.c.bf16 %v695_v32, %v694_v30  ;;  %v286_v28 = vpop.permute.xlu1 %285 }
 0x117   :  { %v392_v58 = vmul.f32 %v1227_v35, %v286_v28  ;;  %v618_v28 = vpop.permute.xlu0 %617 }
 0x118   :  { %803 = vmatprep.subr.bf16.mxu0 %v716_v37 }
 0x119   :  { %v424_v53 = vadd.f32 %v392_v58, %v228_v0 }
 0x11a   :  { %v290_v27 = vpop.permute.xlu1 %289 }
 0x11b   :  { %v393_v8 = vmul.f32 %v1227_v35, %v290_v27  ;;  %v648_v10 = vadd.f32 %v523_v9, %v424_v53 }
 0x11d   :  { %v425_v14 = vadd.f32 %v393_v8, %v229_v63  ;;  %v680_v17 = vmax.f32 %v648_v10, 0.0 }
 0x11f   :  { %v518_v57 = vpop.permute.xlu1 %517 }
 0x120   :  { %v647_v39 = vadd.f32 %v518_v57, %v423_v56 }
 0x122   :  { %v679_v40 = vmax.f32 %v647_v39, 0.0 }
 0x123   :  { %v194_v23 = vpop.permute.xlu1 %193 }
 0x124   :  { %v708_v13 = vpack.c.bf16 %v679_v40, %v678_v50  ;;  %v247_v32 = vmul.f32 %v1232_v36, %v194_v23  ;;  %v230_v50 = vmul.f32 %v1232_v36, %v1211_v31 }
 0x126   :  { %804 = vmatpush3.bf16.msra.mxu0 %v708_v13  ;;  %v533_v13 = vpop.permute.xlu0 %532 }
 0x128   :  { %v362_v29 = vpop.permute.xlu1 %361 }
 0x129   :  { %v411_v49 = vmul.f32 %v1227_v35, %v362_v29 }
 0x12a   :  { %v209_v31 = vpop.permute.xlu0 %208 }
 0x12b   :  { %v443_v18 = vadd.f32 %v411_v49, %v247_v32  ;;  %v414_v49 = vmul.f32 %v1227_v35, %v1189_v12 }
 0x12d   :  { %v603_v51 = vpop.permute.xlu1 %602  ;;  %v667_v60 = vadd.f32 %v618_v28, %v443_v18 }
 0x12e   :  { %v664_v21 = vadd.f32 %v603_v51, %v440_v45  ;;  %v628_v58 = vpop.permute.xlu0 %627 }
 0x12f   :  { %v699_v38 = vmax.f32 %v667_v60, 0.0 }
 0x130   :  { %v696_v22 = vmax.f32 %v664_v21, 0.0  ;;  %v248_v21 = vmul.f32 %v1232_v36, %v199_v26 }
 0x132   :  { %v717_v61 = vpack.c.bf16 %v697_v52, %v696_v22  ;;  %v294_v5 = vpop.permute.xlu1 %293 }
 0x133   :  { %v394_v56 = vmul.f32 %v1227_v35, %v294_v5  ;;  %v444_v5 = vadd.f32 %v412_v62, %v248_v21 }
 0x134   :  { %805 = vmatprep.subr.bf16.mxu0 %v717_v61 }
 0x135   :  { %v426_v40 = vadd.f32 %v394_v56, %v230_v50  ;;  %v235_v56 = vmul.f32 %v1232_v36, %v1178_v6 }
 0x136   :  { %v298_v54 = vpop.permute.xlu1 %297 }
 0x137   :  { %v395_v23 = vmul.f32 %v1227_v35, %v298_v54  ;;  %v650_v3 = vadd.f32 %v533_v13, %v426_v40 }
 0x139   :  { %v427_v42 = vadd.f32 %v395_v23, %v231_v4  ;;  %v682_v29 = vmax.f32 %v650_v3, 0.0 }
 0x13b   :  { %v528_v46 = vpop.permute.xlu1 %527 }
 0x13c   :  { %v649_v16 = vadd.f32 %v528_v46, %v425_v14  ;;  %v232_v14 = vmul.f32 %v1232_v36, %v1217_v33  ;;  %v543_v46 = vpop.permute.xlu0 %542 }
 0x13e   :  { %v681_v19 = vmax.f32 %v649_v16, 0.0 }
 0x13f   :  { %v204_v20 = vpop.permute.xlu1 %203 }
 0x140   :  { %v709_v30 = vpack.c.bf16 %v681_v19, %v680_v17  ;;  %v249_v51 = vmul.f32 %v1232_v36, %v204_v20  ;;  %v250_v19 = vmul.f32 %v1232_v36, %v209_v31  ;;  %v233_v20 = vmul.f32 %v1232_v36, %v1170_v1  ;;  %v633_v26 = vpop.permute.xlu0 %632 }
 0x142   :  { %806 = vmatpush3.bf16.msra.mxu0 %v709_v30  ;;  %v446_v18 = vadd.f32 %v414_v49, %v250_v19 }
 0x144   :  { %v370_v37 = vpop.permute.xlu1 %369  ;;  %v553_v50 = vpop.permute.xlu0 %552 }
 0x145   :  { %v413_v47 = vmul.f32 %v1227_v35, %v370_v37 }
 0x147   :  { %v445_v22 = vadd.f32 %v413_v47, %v249_v51 }
 0x149   :  { %v613_v27 = vpop.permute.xlu1 %612  ;;  %v669_v61 = vadd.f32 %v628_v58, %v445_v22 }
 0x14a   :  { %v666_v25 = vadd.f32 %v613_v27, %v442_v11  ;;  %v670_v11 = vadd.f32 %v633_v26, %v446_v18 }
 0x14b   :  { %v701_v54 = vmax.f32 %v669_v61, 0.0 }
 0x14c   :  { %v698_v15 = vmax.f32 %v666_v25, 0.0  ;;  %v702_v40 = vmax.f32 %v670_v11, 0.0 }
 0x14e   :  { %v718_v57 = vpack.c.bf16 %v699_v38, %v698_v15  ;;  %v302_v39 = vpop.permute.xlu1 %301 }
 0x14f   :  { %v396_v63 = vmul.f32 %v1227_v35, %v302_v39 }
 0x150   :  { %807 = vmatprep.subr.bf16.mxu0 %v718_v57 }
 0x151   :  { %v428_v16 = vadd.f32 %v396_v63, %v232_v14 }
 0x152   :  { %v306_v41 = vpop.permute.xlu1 %305 }
 0x153   :  { %v397_v17 = vmul.f32 %v1227_v35, %v306_v41  ;;  %v652_v30 = vadd.f32 %v543_v46, %v428_v16 }
 0x155   :  { %v429_v2 = vadd.f32 %v397_v17, %v233_v20  ;;  %v684_v1 = vmax.f32 %v652_v30, 0.0 }
 0x157   :  { %v538_v24 = vpop.permute.xlu1 %537 }
 0x158   :  { %v651_v43 = vadd.f32 %v538_v24, %v427_v42 }
 0x15a   :  { %v683_v55 = vmax.f32 %v651_v43, 0.0 }
 0x15b   :  { %v214_v44 = vpop.permute.xlu1 %213 }
 0x15c   :  { %v710_v45 = vpack.c.bf16 %v683_v55, %v682_v29  ;;  %v251_v28 = vmul.f32 %v1232_v36, %v214_v44  ;;  %v725_v55 = vpop.permute.xlu0 %724 }
 0x15e   :  { %808 = vmatpush3.bf16.msra.mxu0 %v710_v45 }
 0x160   :  { %v378_v52 = vpop.permute.xlu1 %377 }
 0x161   :  { %v415_v32 = vmul.f32 %v1227_v35, %v378_v52 }
 0x163   :  { %v447_v15 = vadd.f32 %v415_v32, %v251_v28 }
 0x165   :  { %v623_v0 = vpop.permute.xlu1 %622 }
 0x166   :  { %v668_v53 = vadd.f32 %v623_v0, %v444_v5 }
 0x168   :  { %v700_v8 = vmax.f32 %v668_v53, 0.0 }
 0x16a   :  { %v719_v9 = vpack.c.bf16 %v701_v54, %v700_v8  ;;  %v310_v10 = vpop.permute.xlu1 %309 }
 0x16b   :  { %v398_v33 = vmul.f32 %v1227_v35, %v310_v10 }
 0x16c   :  { %809 = vmatprep.subr.bf16.mxu0 %v719_v9 }
 0x16d   :  { %v430_v27 = vadd.f32 %v398_v33, %v234_v59 }
 0x16e   :  { %v314_v7 = vpop.permute.xlu1 %313 }
 0x16f   :  { %v399_v12 = vmul.f32 %v1227_v35, %v314_v7  ;;  %v654_v23 = vadd.f32 %v553_v50, %v430_v27 }
 0x171   :  { %v431_v41 = vadd.f32 %v399_v12, %v235_v56  ;;  %v686_v42 = vmax.f32 %v654_v23, 0.0 }
 0x173   :  { %v548_v37 = vpop.permute.xlu1 %547 }
 0x174   :  { %v653_v60 = vadd.f32 %v548_v37, %v429_v2 }
 0x176   :  { %v685_v25 = vmax.f32 %v653_v60, 0.0 }
 0x177   :  { %v638_v38 = vpop.permute.xlu1 %637 }
 0x178   :  { %v711_v57 = vpack.c.bf16 %v685_v25, %v684_v1  ;;  %v671_v39 = vadd.f32 %v638_v38, %v447_v15 }
 0x17a   :  { %v703_v34 = vmax.f32 %v671_v39, 0.0  ;;  %810 = vmatpush3.bf16.msra.mxu0 %v711_v57 }
 0x17b   :  { %v558_v4 = vpop.permute.xlu1 %557 }
 0x17c   :  { %v720_v13 = vpack.c.bf16 %v703_v34, %v702_v40  ;;  %v655_v3 = vadd.f32 %v558_v4, %v431_v41 }
 0x17e   :  { %v687_v24 = vmax.f32 %v655_v3, 0.0  ;;  %811 = vmatprep.subr.bf16.mxu0 %v720_v13 }
 0x180   :  { %v712_v35 = vpack.c.bf16 %v687_v24, %v686_v42 }
 0x182   :  { %812 = vmatpush3.bf16.msra.mxu0 %v712_v35 }
 0x185   :  { %771 = vmatmul.mubr.bf16.vlgmr.msra.gmra.mrb[0].mxu0 %v1308_v48 }
 0x258   :  { %v813_v43 = vpop.f32.mrb[0].mxu0 }
 0x259   :  { %v814_v6 = vpop.f32.mrb[1].mxu0 }
 0x25a   :  { %v815_v36 = vadd.f32 %v814_v6, %v813_v43  ;;  %v816_v29 = vpop.f32.mrb[2].mxu0 }
 0x25b   :  { %v817_v44 = vpop.f32.mrb[3].mxu0 }
 0x25c   :  { %v773_v47 = vadd.f32 %v815_v36, %v725_v55 }
 0x25e   :  { %779 = vst.msk [vmem:[#allocation2] sm:$0x7] %vm778_vm0, %v773_v47 }
 0x25f   :  { %866 = shalt.err (!%p863_p4)
}
 0x260   :  { %s867_s29 = scalar_lea.hbm %s1385_s5, 64 }
 0x261   :  { %p868_p5 = scmp.ne.s32.totalorder %s1385_s5, %s867_s29  ;;  %p871_p6 = scmp.lt.u32.totalorder %s867_s29, %s1385_s5 }
 0x263   :  { %p873_p7 = pnand %p871_p6, %p868_p5 }
 0x265   :  { %876 = shalt.err (!%p873_p7)
}
 0x266   :  { %789 = dma.vmem_to_hbm [thread:$0]  %s787_s3, 64, %s1385_s5, [#allocation3]  }
 0x267   :  { %877 = dma.done.wait [#allocation3], 64  }
 0x268   :  { %878 = vsyncadd [#allocation3], 4294967232 }
 0x269   :  { %793 = vsyncpa [#allocation3], 1 }

</bundles_post_ra>
